<compile_context>
chip_gen: v7x
topology: tpu7x:2x2x1
jax: 0.10.0
libtpu: 0.0.40
codegen_flags: <defaults>
</compile_context>

<pallas_src>
from functools import lru_cache, partial

import numpy as np
import jax
import jax.numpy as jnp
from jax.experimental import pallas as pl
from jax.experimental.pallas import tpu as pltpu


# --------------------------------------------------------------------------
# glue: SAME-pad geometry and the folded (reflect-pad + avg-pool) matrix
# --------------------------------------------------------------------------
def _same_pad(L, kernel_size, stride):
    L_out = (L + stride - 1) // stride
    p = max(0, (L_out - 1) * stride + kernel_size - L)
    pad_left = p // 2
    pad_right = p - pad_left
    return L_out, pad_left, pad_right


def _round_up(x, m):
    return ((x + m - 1) // m) * m


@lru_cache(maxsize=None)
def _pool_matrix(L, kernel_size, stride, L_out_pad, dtype):
    """Constant (L, L_out_pad) tap-count matrix with reflect padding baked in.

    x2d @ P, scaled by 1/kernel_size afterwards, equals
    AvgPool1d(kernel_size, stride)(reflect_pad_same(x)) along the last axis.
    Built with numpy (single constant, no traced scatter ops), cached per
    (L, kernel_size, stride, L_out_pad, dtype).
    """
    L_out, pad_l, _ = _same_pad(L, kernel_size, stride)
    P = np.zeros((L, L_out_pad), dtype=np.float32)
    for j in range(L_out):
        for t in range(kernel_size):
            pos = j * stride + t - pad_l          # position in the un-padded signal
            if pos < 0:                           # PyTorch 'reflect' (no edge repeat)
                pos = -pos
            elif pos >= L:
                pos = 2 * (L - 1) - pos
            P[pos, j] += 1.0                      # reflected taps may coincide -> count 2
    return jnp.asarray(P, dtype=dtype)            # exact in bf16 (small integers)


def _pick_tiles(M, L, L_out_pad, itemsize, sub):
    """Tile sizes under a conservative per-generation-safe VMEM budget."""
    budget = 24 * 1024 * 1024                     # fits v5e/v6e/v7x scoped VMEM
    TN = min(512, L_out_pad)                      # multiple of 128 (L_out_pad is)
    while TN > 128 and 2 * L * TN * itemsize > budget // 2:
        TN //= 2
    p_bytes = 2 * L * TN * itemsize               # double-buffered P slab
    per_row = 2 * (L + TN) * itemsize + 4 * TN    # x + out (double-buffered) + f32 temp
    avail = budget - p_bytes
    tm = avail // per_row if avail > per_row * sub else sub
    tm = max(sub, min(int(tm), 1024))
    tm = (tm // sub) * sub
    tm = min(tm, _round_up(M, sub))
    tm = max(tm, sub)
    return tm, TN


# --------------------------------------------------------------------------
# Pallas kernel: one MXU matmul per (TM, TN) output tile + post-scale
# --------------------------------------------------------------------------
def _avgpool_kernel(x_ref, p_ref, o_ref, *, inv_k):
    acc = jnp.dot(x_ref[...], p_ref[...], preferred_element_type=jnp.float32)
    o_ref[...] = (acc * inv_k).astype(o_ref.dtype)


# --------------------------------------------------------------------------
# wrapper
# --------------------------------------------------------------------------
def my_avg_pool1d_pad_same(x, kernel_size, stride):
    """x: (N, C, L) -> (N, C, L_out), matching MyAvgPool1dPadSame.forward."""
    N, C, L = x.shape
    L_out, pad_l, pad_r = _same_pad(L, kernel_size, stride)
    if pad_l >= L or pad_r >= L:
        # PyTorch reflect padding requires pad < input length.
        raise ValueError(
            f"reflect padding requires pad < input length "
            f"(L={L}, pad_left={pad_l}, pad_right={pad_r})")

    M = N * C
    dtype = x.dtype
    itemsize = np.dtype(dtype).itemsize
    sub = 16 if dtype == jnp.bfloat16 else 8

    L_out_pad = _round_up(L_out, 128)             # lane-dense output slab
    TM, TN = _pick_tiles(M, L, L_out_pad, itemsize, sub)
    grid = (pl.cdiv(M, TM), pl.cdiv(L_out_pad, TN))

    P = _pool_matrix(L, kernel_size, stride, L_out_pad, np.dtype(dtype))
    x2d = x.reshape(M, L)

    out2d = pl.pallas_call(
        partial(_avgpool_kernel, inv_k=float(1.0 / kernel_size)),
        out_shape=jax.ShapeDtypeStruct((M, L_out_pad), dtype),
        grid_spec=pltpu.PrefetchScalarGridSpec(
            num_scalar_prefetch=0,
            grid=grid,
            in_specs=[
                pl.BlockSpec((TM, L), lambda i, j: (i, 0)),   # x tile (resident over j)
                pl.BlockSpec((L, TN), lambda i, j: (0, j)),   # P column slab
            ],
            out_specs=pl.BlockSpec((TM, TN), lambda i, j: (i, j)),
        ),
        compiler_params=pltpu.CompilerParams(
            dimension_semantics=("parallel", "parallel"),
            vmem_limit_bytes=32 * 1024 * 1024,
        ),
        cost_estimate=pl.CostEstimate(
            flops=int(2 * M * L * L_out_pad),
            transcendentals=0,
            bytes_accessed=int(itemsize * (M * L + L * L_out_pad + M * L_out_pad)),
        ),
    )(x2d, P)

    return out2d[:, :L_out].reshape(N, C, L_out)


# --------------------------------------------------------------------------
# pure-JAX reference (mirrors the PyTorch forward: reflect SAME pad -> AvgPool1d)
# --------------------------------------------------------------------------
def reference(x, kernel_size, stride):
    L = x.shape[-1]
    L_out, pad_l, pad_r = _same_pad(L, kernel_size, stride)
    xp = jnp.pad(x, ((0, 0), (0, 0), (pad_l, pad_r)), mode='reflect')
    return jnp.stack(
        [xp[:, :, j * stride:j * stride + kernel_size].mean(axis=-1)
         for j in range(L_out)],
        axis=-1,
    )


if __name__ == "__main__":
    key = jax.random.PRNGKey(0)
    N, C, L = 2, 4, 16
    x = jax.random.normal(key, (N, C, L), jnp.float32)

    # float32 path
    for kernel_size, stride in ((3, 2), (5, 2), (2, 2)):
        out = jax.block_until_ready(my_avg_pool1d_pad_same(x, kernel_size, stride))
        ref = reference(x, kernel_size, stride)
        L_out = (L + stride - 1) // stride
        assert out.shape == (N, C, L_out), out.shape
        if not jnp.allclose(out, ref, rtol=1e-5, atol=1e-5):
            err = float(jnp.max(jnp.abs(out - ref)))
            raise AssertionError(
                f"kernel mismatch vs reference (k={kernel_size}, s={stride}), "
                f"max abs err = {err}")

    # bfloat16 path: binary P in bf16, f32 MXU accumulation, post-scale.
    xb = x.astype(jnp.bfloat16)
    outb = jax.block_until_ready(my_avg_pool1d_pad_same(xb, 3, 2))
    refb = reference(xb.astype(jnp.float32), 3, 2)
    assert outb.dtype == jnp.bfloat16
    if not jnp.allclose(outb.astype(jnp.float32), refb, rtol=5e-2, atol=5e-2):
        err = float(jnp.max(jnp.abs(outb.astype(jnp.float32) - refb)))
        raise AssertionError(f"bf16 kernel mismatch, max abs err = {err}")

    print("KERNEL_OK")
</pallas_src>

<mosaic_0001>
module attributes {stable_mosaic.version = 11 : i64} {
  func.func @_avgpool_kernel(%arg0: i32, %arg1: i32, %arg2: memref<8x16xf32, #tpu.memory_space<vmem>>, %arg3: memref<16x128xf32, #tpu.memory_space<vmem>>, %arg4: memref<8x128xf32, #tpu.memory_space<vmem>>) attributes {dimension_semantics = [#tpu.dimension_semantics<parallel>, #tpu.dimension_semantics<parallel>], iteration_bounds = array<i64: 1, 1>, scalar_prefetch = 0 : i64, scratch_operands = 0 : i64, tpu.core_type = #tpu.core_type<tc>, window_params = [{transform_indices = @transform_0, window_bounds = array<i64: 8, 16>}, {transform_indices = @transform_1, window_bounds = array<i64: 16, 128>}, {transform_indices = @transform_2, window_bounds = array<i64: 8, 128>}]} {
    %c0 = arith.constant 0 : index
    %c0_0 = arith.constant 0 : index
    %0 = vector.load %arg2[%c0, %c0_0] : memref<8x16xf32, #tpu.memory_space<vmem>>, vector<8x16xf32>
    %c0_1 = arith.constant 0 : index
    %c0_2 = arith.constant 0 : index
    %1 = vector.load %arg3[%c0_1, %c0_2] : memref<16x128xf32, #tpu.memory_space<vmem>>, vector<16x128xf32>
    %cst = arith.constant dense<0.000000e+00> : vector<8x128xf32>
    %2 = tpu.matmul %0, %1, %cst {dimension_numbers = #tpu.dot_dimension_numbers<[1], [0], [0], [1], [0, 0, 1, 1], [], []>} : vector<8x16xf32>, vector<16x128xf32>, vector<8x128xf32> -> vector<8x128xf32>
    %cst_3 = arith.constant 0.333333343 : f32
    %3 = vector.broadcast %cst_3 : f32 to vector<8x128xf32>
    %4 = arith.mulf %2, %3 : vector<8x128xf32>
    %c0_4 = arith.constant 0 : index
    %c0_5 = arith.constant 0 : index
    %5 = vector.load %arg4[%c0_4, %c0_5] : memref<8x128xf32, #tpu.memory_space<vmem>>, vector<8x128xf32>
    tpu.vector_store %arg4[%c0_4, %c0_5], %4 {strides = array<i32>} : memref<8x128xf32, #tpu.memory_space<vmem>>, vector<8x128xf32>,
    return
  }
  func.func @transform_0(%arg0: i32, %arg1: i32) -> (i32, i32) {
    %c0_i32 = arith.constant 0 : i32
    %c0_i32_0 = arith.constant 0 : i32
    return %arg0, %c0_i32 : i32, i32
  }
  func.func @transform_1(%arg0: i32, %arg1: i32) -> (i32, i32) {
    %c0_i32 = arith.constant 0 : i32
    %c0_i32_0 = arith.constant 0 : i32
    return %c0_i32, %arg1 : i32, i32
  }
  func.func @transform_2(%arg0: i32, %arg1: i32) -> (i32, i32) {
    %c0_i32 = arith.constant 0 : i32
    return %arg0, %arg1 : i32, i32
  }
}

</mosaic_0001>

<bundles_post_ra>
// kernel: tpu_custom_call.1
= control target key start
LH: loop header
LB: loop body
LE: loop exit
PB: predicated region body
PF: predicated region fallthrough
CT: control target
= control target key end

     0   :  { %7 = vsyncpa [#allocation3], 0  ;;  %s293_s0 = inlined_call_operand.hbm [shape: f32[8,16], index: 0, kind: input, shape index: {}]   ;;  %s294_s1 = inlined_call_operand.hbm [shape: f32[16,128], index: 1, kind: input, shape index: {}]   ;;  %s295_s2 = inlined_call_operand.hbm [shape: f32[8,128], index: 2, kind: output, shape index: {}]  }
   0x1   :  { %8 = vsyncpa [#allocation6], 0 }
   0x2   :  { %9 = vsyncpa [#allocation4], 0  ;;  %s227_s9 = smov [#allocation2]   ;;  %s228_s11 = smov [#allocation5]  }
   0x3   :  { %s16_s10 = sshll.u32 %s227_s9, 4  ;;  %s25_s12 = sshll.u32 %s228_s11, 4  ;;  %s17_s10 = int_to_ptr.vmem [resolvable:$true] %s16_s10  ;;  %s250_s12 = int_to_ptr.vmem [resolvable:$true] %s25_s12 }
   0x4   :  { %s155_s15 = scalar_lea.hbm %s293_s0, 128 }
   0x5   :  { %p156_p0 = scmp.ne.s32.totalorder %s293_s0, %s155_s15  ;;  %p159_p1 = scmp.lt.u32.totalorder %s155_s15, %s293_s0 }
   0x7   :  { %p161_p2 = pnand %p159_p1, %p156_p0 }
   0x9   :  { %164 = shalt.err (!%p161_p2)
}
   0xa   :  { %s165_s20 = scalar_lea.vmem %s17_s10, 128  ;;  %p170_p4 = scmp.lt.s32.totalorder %s17_s10, %s17_s10 }
   0xb   :  { %p166_p3 = scmp.ne.s32.totalorder %s17_s10, %s165_s20  ;;  %p171_p5 = scmp.lt.s32.totalorder %s165_s20, %s165_s20 }
   0xd   :  { %p172_p6 = por %p171_p5, %p170_p4 }
   0xf   :  { %p173_p7 = pnand %p172_p6, %p166_p3 }
  0x11   :  { %176 = shalt.err (!%p173_p7)
}
  0x12   :  { %19 = dma.hbm_to_vmem [thread:$0]  %s293_s0, 128, %s17_s10, [#allocation3]  }
  0x13   :  { %s177_s25 = scalar_lea.hbm %s294_s1, 256 }
  0x14   :  { %p178_p8 = scmp.ne.s32.totalorder %s294_s1, %s177_s25  ;;  %p181_p9 = scmp.lt.u32.totalorder %s177_s25, %s294_s1 }
  0x16   :  { %p183_p10 = pnand %p181_p9, %p178_p8 }
  0x18   :  { %186 = shalt.err (!%p183_p10)
}
  0x19   :  { %s187_s30 = scalar_lea.vmem %s250_s12, 256  ;;  %p192_p12 = scmp.lt.s32.totalorder %s250_s12, %s250_s12 }
  0x1a   :  { %p188_p11 = scmp.ne.s32.totalorder %s250_s12, %s187_s30  ;;  %p193_p13 = scmp.lt.s32.totalorder %s187_s30, %s187_s30 }
  0x1c   :  { %p194_p0 = por %p193_p13, %p192_p12 }
  0x1e   :  { %p195_p1 = pnand %p194_p0, %p188_p11 }
  0x20   :  { %198 = shalt.err (!%p195_p1)
}
  0x21   :  { %s229_s0 = smov 128   ;;  %s230_s3 = smov 8  }
  0x22   :  { %31 = dma.hbm_to_vmem [thread:$0]  %s294_s1, 256, %s250_s12, [#allocation6], %s229_s0, %s229_s0, %s230_s3  }
  0x23   :  { %221 = dma.done.wait [#allocation3], 128  }
  0x24   :  { %222 = vsyncadd [#allocation3], 4294967168 }
  0x25   :  { %223 = dma.done.wait [#allocation6], 256  }
  0x26   :  { %224 = vsyncadd [#allocation6], 4294967040  ;;  %v231_v0 = vmov 0.0|0.0   ;;  %vm232_vm0 = vmmov 0   ;;  %v233_v1 = vmov 0.0   ;;  %v39_v2 = vld [vmem:[#allocation5] sm:$0xff] }
  0x27   :  { %144 = vmatprep.subr.bf16.mxu0 %v231_v0  ;;  %141 = vmatprep.mubr.msk.f32.mxu0 %vm232_vm0, %v233_v1  ;;  %v40_v3 = vld [vmem:[#allocation5 + $0x8] sm:$0xff]  ;;  %v38_v5 = vld [vmem:[#allocation2] sm:$0xff]  ;;  %vm41_vm1 = vcmask 130048   ;;  %s234_s6 = smov [#allocation7]  }
  0x28   :  { %v145_v4 = vpack.c.bf16 %v40_v3, %v39_v2  ;;  %s123_s7 = sshll.u32 %s234_s6, 4  ;;  %s124_s7 = int_to_ptr.vmem [resolvable:$true] %s123_s7 }
  0x29   :  { %s199_s1 = scalar_lea.vmem %s124_s7, 128  ;;  %p204_p3 = scmp.lt.s32.totalorder %s124_s7, %s124_s7 }
  0x2a   :  { %146 = vmatpush3.bf16.msra.mxu0 %v145_v4  ;;  %p200_p2 = scmp.ne.s32.totalorder %s124_s7, %s199_s1  ;;  %p205_p4 = scmp.lt.s32.totalorder %s199_s1, %s199_s1 }
  0x2c   :  { %p206_p5 = por %p205_p4, %p204_p3 }
  0x2d   :  { %142 = vmatmul.mubr.msk.f32.vlgmr.msra.gmra.mrb[0].mxu0 %vm41_vm1, %v38_v5 }
  0x2e   :  { %p207_p6 = pnand %p206_p5, %p200_p2 }
 0x100   :  { %v111_v6 = vpop.f32.mrb[0].mxu0 }
 0x101   :  { %v115_v7 = vmul.f32 0.33333334, %v111_v6  ;;  %v143_v8 = vpop.f32.mrb[1].mxu0 }
 0x103   :  { %116 = vst [vmem:[#allocation7] sm:$0xff] %v115_v7 }
 0x104   :  { %210 = shalt.err (!%p207_p6)
}
 0x105   :  { %s211_s10 = scalar_lea.hbm %s295_s2, 128 }
 0x106   :  { %p212_p7 = scmp.ne.s32.totalorder %s295_s2, %s211_s10  ;;  %p215_p8 = scmp.lt.u32.totalorder %s211_s10, %s295_s2 }
 0x108   :  { %p217_p9 = pnand %p215_p8, %p212_p7 }
 0x10a   :  { %220 = shalt.err (!%p217_p9)
}
 0x10b   :  { %126 = dma.vmem_to_hbm [thread:$0]  %s124_s7, 128, %s295_s2, [#allocation4]  }
 0x10c   :  { %225 = dma.done.wait [#allocation4], 128  }
 0x10d   :  { %226 = vsyncadd [#allocation4], 4294967168 }
 0x10e   :  { %130 = vsyncpa [#allocation3], 1 }
 0x10f   :  { %131 = vsyncpa [#allocation6], 1 }
 0x110   :  { %132 = vsyncpa [#allocation4], 1 }

</bundles_post_ra>
